<compile_context>
chip_gen: v7x
topology: tpu7x:2x2x1
jax: 0.10.0
libtpu: 0.0.40
codegen_flags: <defaults>
</compile_context>

<pallas_src>
import functools

import jax
import jax.numpy as jnp
from jax import lax
from jax.experimental import pallas as pl
from jax.experimental.pallas import tpu as pltpu


def _round_up(v: int, m: int) -> int:
    return ((v + m - 1) // m) * m


def _vmem_budget_bytes() -> int:
    """Generation-aware VMEM budget (~75% of physical per-core VMEM)."""
    cap = None
    try:
        cap = int(pltpu.get_tpu_info().vmem_capacity_bytes)
    except Exception:
        cap = None
    if not cap or cap <= 0:
        cap = 64 * 1024 * 1024          # conservative fallback: v7x physical VMEM
    return int(cap) * 3 // 4            # 96 MiB on v5e/v6e, 48 MiB on v7x


# --------------------------------------------------------------------------- #
# Fast path: adj fully resident, single grid invocation, unrolled recurrence. #
# --------------------------------------------------------------------------- #
def _graph_encoder_resident_kernel(la_ref, x_ref, adj_ref, out_ref, *, order: int):
    """la_ref: SMEM (order,); x_ref: VMEM (Np, Fp); adj_ref: VMEM (Np, Np)."""
    a = adj_ref[...]
    y = la_ref[0] * jnp.dot(a, x_ref[...], preferred_element_type=jnp.float32)
    for k in range(1, order):           # static unroll: order is small (e.g. 4)
        y = y + la_ref[k] * jnp.dot(a, y, preferred_element_type=jnp.float32)
    out_ref[...] = (y * (1.0 / order)).astype(out_ref.dtype)


# --------------------------------------------------------------------------- #
# Streamed path: adj row tiles streamed per recurrence step (large graphs).   #
# --------------------------------------------------------------------------- #
def _graph_encoder_streamed_kernel(la_ref, x_ref, adj_ref, out_ref, y0_ref, y1_ref,
                                   *, order: int, tm: int):
    """Grid = (order, num_row_tiles); k (recurrence step) outer, i (row tile) inner.

    la_ref : SMEM (order,)   scalar-prefetched coefficients
    x_ref  : VMEM (Np, Fp)   resident (constant block index)
    adj_ref: VMEM (tm, Np)   streamed row tile of adj
    out_ref: VMEM (tm, Fp)   h2 rows (written only on the last recurrence step)
    y0/y1  : VMEM (Np, Fp)   ping-pong carry of the vector recurrence
    """
    k = pl.program_id(0)
    i = pl.program_id(1)
    row0 = pl.multiple_of(i * tm, tm)
    a = adj_ref[...]                                     # (tm, Np)

    # Step 0:  y = la[0] * (adj @ x)        -> slot 0
    @pl.when(k == 0)
    def _():
        y0_ref[pl.ds(row0, tm), :] = la_ref[0] * jnp.dot(
            a, x_ref[...], preferred_element_type=jnp.float32)

    # Step k odd:  read slot 0, write slot 1:   y <- y + la[k] * (adj @ y)
    @pl.when(jnp.logical_and(k > 0, lax.rem(k, 2) == 1))
    def _():
        y1_ref[pl.ds(row0, tm), :] = (
            y0_ref[pl.ds(row0, tm), :]
            + la_ref[k] * jnp.dot(a, y0_ref[...], preferred_element_type=jnp.float32))

    # Step k even (>0):  read slot 1, write slot 0
    @pl.when(jnp.logical_and(k > 0, lax.rem(k, 2) == 0))
    def _():
        y0_ref[pl.ds(row0, tm), :] = (
            y1_ref[pl.ds(row0, tm), :]
            + la_ref[k] * jnp.dot(a, y1_ref[...], preferred_element_type=jnp.float32))

    # Emit only on the final recurrence step (perf review: no redundant writes).
    @pl.when(k == order - 1)
    def _():
        final = y0_ref if (order - 1) % 2 == 0 else y1_ref   # static slot pick
        out_ref[...] = (final[pl.ds(row0, tm), :] * (1.0 / order)).astype(out_ref.dtype)


# --------------------------------------------------------------------------- #
# Wrapper                                                                     #
# --------------------------------------------------------------------------- #
def graph_encoder_forward(x, adj, la, *, order: int = 4,
                          force_stream: bool = False, tm=None):
    """x: (N, F) f32, adj: (N, N) f32, la: (order,) f32 -> (N, 2F) f32."""
    n, f = x.shape
    assert adj.shape == (n, n)

    if order == 0:
        # PyTorch order == 0 branch: h2 = x.
        return jnp.concatenate([x, x], axis=-1)
    assert la.shape == (order,)

    x = x.astype(jnp.float32)
    adj = adj.astype(jnp.float32)
    la = la.astype(jnp.float32)

    # Lane-dense feature axis: zero-pad F to a multiple of 128 (zero columns are
    # preserved exactly by the linear recurrence and sliced off afterwards).
    fp = _round_up(f, 128)
    budget = _vmem_budget_bytes()

    n_fast = _round_up(n, 128)
    # adj + (x, y carry, out) with a 2x safety factor for pipeline buffers / temps.
    fast_bytes = 4 * (n_fast * n_fast + 4 * n_fast * fp)
    use_fast = (not force_stream) and (2 * fast_bytes <= budget)

    if use_fast:
        np_ = n_fast
        x_p = jnp.pad(x, ((0, np_ - n), (0, fp - f))) if (np_ != n or fp != f) else x
        adj_p = jnp.pad(adj, ((0, np_ - n), (0, np_ - n))) if np_ != n else adj

        kernel = functools.partial(_graph_encoder_resident_kernel, order=order)
        h2_p = pl.pallas_call(
            kernel,
            out_shape=jax.ShapeDtypeStruct((np_, fp), jnp.float32),
            grid_spec=pltpu.PrefetchScalarGridSpec(
                num_scalar_prefetch=1,                       # la -> SMEM
                grid=(1,),
                in_specs=[
                    pl.BlockSpec((np_, fp), lambda i, la_r: (0, 0)),    # x resident
                    pl.BlockSpec((np_, np_), lambda i, la_r: (0, 0)),   # adj resident
                ],
                out_specs=pl.BlockSpec((np_, fp), lambda i, la_r: (0, 0)),
            ),
            compiler_params=pltpu.CompilerParams(
                dimension_semantics=("arbitrary",),
                vmem_limit_bytes=budget,
            ),
            cost_estimate=pl.CostEstimate(
                flops=2 * order * np_ * np_ * fp,
                transcendentals=0,
                bytes_accessed=4 * (np_ * np_ + 2 * np_ * fp)),
        )(la, x_p, adj_p)
    else:
        # Streamed path for graphs whose adjacency does not fit VMEM.
        if tm is None:
            tm = 128
            for cand in (512, 256, 128):
                cand = min(cand, n_fast)
                np_c = _round_up(n, cand)
                need = 4 * (2 * np_c * fp       # resident x (double-buffered)
                            + 2 * np_c * fp     # y ping/pong scratch
                            + 2 * cand * np_c   # adj row-tile double buffer
                            + 2 * cand * fp)    # out-tile double buffer
                if need <= budget:
                    tm = cand
                    break
            # TODO(synk): graphs too large for a VMEM-resident (N, Fp) carry would
            # additionally need F-axis tiling; out of scope here.
        tm = max(8, min(int(tm), n_fast))
        np_ = _round_up(n, tm)                   # zero-pad N (replaces tm=N fallback)
        num_tiles = np_ // tm

        x_p = jnp.pad(x, ((0, np_ - n), (0, fp - f))) if (np_ != n or fp != f) else x
        adj_p = jnp.pad(adj, ((0, np_ - n), (0, np_ - n))) if np_ != n else adj

        kernel = functools.partial(_graph_encoder_streamed_kernel, order=order, tm=tm)
        h2_p = pl.pallas_call(
            kernel,
            out_shape=jax.ShapeDtypeStruct((np_, fp), jnp.float32),
            grid_spec=pltpu.PrefetchScalarGridSpec(
                num_scalar_prefetch=1,                       # la -> SMEM
                grid=(order, num_tiles),
                in_specs=[
                    # x: resident (constant block index -> fetched once).
                    pl.BlockSpec((np_, fp), lambda k, i, la_r: (0, 0)),
                    # adj: streamed row tiles.
                    pl.BlockSpec((tm, np_), lambda k, i, la_r: (i, 0)),
                ],
                out_specs=pl.BlockSpec((tm, fp), lambda k, i, la_r: (i, 0)),
                scratch_shapes=[
                    pltpu.VMEM((np_, fp), jnp.float32),      # y ping
                    pltpu.VMEM((np_, fp), jnp.float32),      # y pong
                ],
            ),
            compiler_params=pltpu.CompilerParams(
                # The recurrence couples the k steps and the row tiles share the y
                # scratch, so both axes stay sequential on one core.
                dimension_semantics=("arbitrary", "arbitrary"),
                vmem_limit_bytes=budget,
            ),
            cost_estimate=pl.CostEstimate(
                flops=2 * order * np_ * np_ * fp,
                transcendentals=0,
                bytes_accessed=4 * (order * np_ * np_ + np_ * fp + order * np_ * fp)),
        )(la, x_p, adj_p)

    h2 = h2_p[:n, :f]
    # h = cat([h2, h2], dim=-1) — duplication done cheaply outside the kernel.
    return jnp.concatenate([h2, h2], axis=-1)


def graph_encoder_ref(x, adj, la, *, order: int = 4):
    adj_temp = la[0] * adj
    for i in range(order - 1):
        adj_temp = adj_temp + la[i + 1] * (adj @ adj_temp)
    attn = adj_temp / order
    h2 = attn @ x
    return jnp.concatenate([h2, h2], axis=-1)


if __name__ == "__main__":
    ORDER = 4
    N = 128          # number of graph nodes
    FEAT_DIM = 32    # feat_dim (hidden_dim only feeds the unused/broken SAL branch)

    key = jax.random.PRNGKey(0)
    kx, kadj, kla = jax.random.split(key, 3)

    x = jax.random.normal(kx, (N, FEAT_DIM), dtype=jnp.float32)
    # Scaled adjacency so repeated powers stay well-conditioned numerically.
    adj = jax.random.uniform(kadj, (N, N), dtype=jnp.float32) * (2.0 / N)
    # nn.Parameter(torch.ones(order)) + normal_(mean=1.0, std=0.001)
    la = 1.0 + 0.001 * jax.random.normal(kla, (ORDER,), dtype=jnp.float32)

    # 1) Default dispatch -> fast adj-resident single-invocation path.
    out = graph_encoder_forward(x, adj, la, order=ORDER)
    out = jax.block_until_ready(out)
    ref = graph_encoder_ref(x, adj, la, order=ORDER)
    assert out.shape == (N, 2 * FEAT_DIM), out.shape
    assert jnp.allclose(out, ref, rtol=1e-5, atol=1e-4), "fast path mismatch"

    # 2) Streamed (large-graph) path, exercised on a small non-tile-aligned case:
    #    N=200 padded to 256, tm=128 -> grid=(order, 2) with the ping-pong carry.
    N2, F2 = 200, 48
    x2 = jax.random.normal(kx, (N2, F2), dtype=jnp.float32)
    adj2 = jax.random.uniform(kadj, (N2, N2), dtype=jnp.float32) * (2.0 / N2)
    out2 = graph_encoder_forward(x2, adj2, la, order=ORDER,
                                 force_stream=True, tm=128)
    out2 = jax.block_until_ready(out2)
    ref2 = graph_encoder_ref(x2, adj2, la, order=ORDER)
    assert out2.shape == (N2, 2 * F2), out2.shape
    assert jnp.allclose(out2, ref2, rtol=1e-5, atol=1e-4), "streamed path mismatch"

    print("KERNEL_OK")
</pallas_src>

<mosaic_0001>
module attributes {stable_mosaic.version = 11 : i64} {
  func.func @_graph_encoder_resident_kernel(%arg0: i32, %arg1: memref<4xf32, #tpu.memory_space<smem>>, %arg2: memref<128x128xf32, #tpu.memory_space<vmem>>, %arg3: memref<128x128xf32, #tpu.memory_space<vmem>>, %arg4: memref<128x128xf32, #tpu.memory_space<vmem>>) attributes {dimension_semantics = [#tpu.dimension_semantics<arbitrary>], iteration_bounds = array<i64: 1>, scalar_prefetch = 1 : i64, scratch_operands = 0 : i64, tpu.core_type = #tpu.core_type<tc>, window_params = [{pipeline_mode = #tpu.pipeline_mode<synchronous>, transform_indices = @transform_0, window_bounds = array<i64: 128, 128>}, {pipeline_mode = #tpu.pipeline_mode<synchronous>, transform_indices = @transform_1, window_bounds = array<i64: 128, 128>}, {pipeline_mode = #tpu.pipeline_mode<synchronous>, transform_indices = @transform_2, window_bounds = array<i64: 128, 128>}]} {
    %c0 = arith.constant 0 : index
    %c0_0 = arith.constant 0 : index
    %0 = vector.load %arg3[%c0, %c0_0] : memref<128x128xf32, #tpu.memory_space<vmem>>, vector<128x128xf32>
    %c0_1 = arith.constant 0 : index
    %1 = memref.load %arg1[%c0_1] : memref<4xf32, #tpu.memory_space<smem>>
    %c0_2 = arith.constant 0 : index
    %c0_3 = arith.constant 0 : index
    %2 = vector.load %arg2[%c0_2, %c0_3] : memref<128x128xf32, #tpu.memory_space<vmem>>, vector<128x128xf32>
    %cst = arith.constant dense<0.000000e+00> : vector<128x128xf32>
    %3 = tpu.matmul %0, %2, %cst {dimension_numbers = #tpu.dot_dimension_numbers<[1], [0], [0], [1], [0, 0, 1, 1], [], []>} : vector<128x128xf32>, vector<128x128xf32>, vector<128x128xf32> -> vector<128x128xf32>
    %4 = vector.broadcast %1 : f32 to vector<128x128xf32>
    %5 = arith.mulf %4, %3 : vector<128x128xf32>
    %c1 = arith.constant 1 : index
    %6 = memref.load %arg1[%c1] : memref<4xf32, #tpu.memory_space<smem>>
    %cst_4 = arith.constant dense<0.000000e+00> : vector<128x128xf32>
    %7 = tpu.matmul %0, %5, %cst_4 {dimension_numbers = #tpu.dot_dimension_numbers<[1], [0], [0], [1], [0, 0, 1, 1], [], []>} : vector<128x128xf32>, vector<128x128xf32>, vector<128x128xf32> -> vector<128x128xf32>
    %8 = vector.broadcast %6 : f32 to vector<128x128xf32>
    %9 = arith.mulf %8, %7 : vector<128x128xf32>
    %10 = arith.addf %5, %9 : vector<128x128xf32>
    %c2 = arith.constant 2 : index
    %11 = memref.load %arg1[%c2] : memref<4xf32, #tpu.memory_space<smem>>
    %cst_5 = arith.constant dense<0.000000e+00> : vector<128x128xf32>
    %12 = tpu.matmul %0, %10, %cst_5 {dimension_numbers = #tpu.dot_dimension_numbers<[1], [0], [0], [1], [0, 0, 1, 1], [], []>} : vector<128x128xf32>, vector<128x128xf32>, vector<128x128xf32> -> vector<128x128xf32>
    %13 = vector.broadcast %11 : f32 to vector<128x128xf32>
    %14 = arith.mulf %13, %12 : vector<128x128xf32>
    %15 = arith.addf %10, %14 : vector<128x128xf32>
    %c3 = arith.constant 3 : index
    %16 = memref.load %arg1[%c3] : memref<4xf32, #tpu.memory_space<smem>>
    %cst_6 = arith.constant dense<0.000000e+00> : vector<128x128xf32>
    %17 = tpu.matmul %0, %15, %cst_6 {dimension_numbers = #tpu.dot_dimension_numbers<[1], [0], [0], [1], [0, 0, 1, 1], [], []>} : vector<128x128xf32>, vector<128x128xf32>, vector<128x128xf32> -> vector<128x128xf32>
    %18 = vector.broadcast %16 : f32 to vector<128x128xf32>
    %19 = arith.mulf %18, %17 : vector<128x128xf32>
    %20 = arith.addf %15, %19 : vector<128x128xf32>
    %cst_7 = arith.constant 2.500000e-01 : f32
    %21 = vector.broadcast %cst_7 : f32 to vector<128x128xf32>
    %22 = arith.mulf %20, %21 : vector<128x128xf32>
    %c0_8 = arith.constant 0 : index
    %c0_9 = arith.constant 0 : index
    %23 = vector.load %arg4[%c0_8, %c0_9] : memref<128x128xf32, #tpu.memory_space<vmem>>, vector<128x128xf32>
    tpu.vector_store %arg4[%c0_8, %c0_9], %22 {strides = array<i32>} : memref<128x128xf32, #tpu.memory_space<vmem>>, vector<128x128xf32>,
    return
  }
  func.func @transform_0(%arg0: i32, %arg1: memref<4xf32, #tpu.memory_space<smem>>) -> (i32, i32) {
    %c0_i32 = arith.constant 0 : i32
    %c0_i32_0 = arith.constant 0 : i32
    %c0_i32_1 = arith.constant 0 : i32
    return %c0_i32, %c0_i32_0 : i32, i32
  }
  func.func @transform_1(%arg0: i32, %arg1: memref<4xf32, #tpu.memory_space<smem>>) -> (i32, i32) {
    %c0_i32 = arith.constant 0 : i32
    %c0_i32_0 = arith.constant 0 : i32
    %c0_i32_1 = arith.constant 0 : i32
    return %c0_i32, %c0_i32_0 : i32, i32
  }
  func.func @transform_2(%arg0: i32, %arg1: memref<4xf32, #tpu.memory_space<smem>>) -> (i32, i32) {
    %c0_i32 = arith.constant 0 : i32
    %c0_i32_0 = arith.constant 0 : i32
    %c0_i32_1 = arith.constant 0 : i32
    return %c0_i32, %c0_i32_0 : i32, i32
  }
}

</mosaic_0001>

<bundles_post_ra>
// kernel: tpu_custom_call.1
= control target key start
LH: loop header
LB: loop body
LE: loop exit
PB: predicated region body
PF: predicated region fallthrough
CT: control target
= control target key end

     0   :  { %s1825_s0 = inlined_call_operand.hbm [shape: f32[4], index: 0, kind: input, shape index: {}]   ;;  %s1826_s1 = inlined_call_operand.hbm [shape: f32[128,128], index: 1, kind: input, shape index: {}]   ;;  %s1827_s2 = inlined_call_operand.hbm [shape: f32[128,128], index: 2, kind: input, shape index: {}]   ;;  %s1828_s3 = inlined_call_operand.hbm [shape: f32[128,128], index: 3, kind: output, shape index: {}]  }
   0x1   :  { %s1316_s14 = scalar_lea.hbm %s1825_s0, 16 }
   0x2   :  { %p1317_p0 = scmp.ne.s32.totalorder %s1825_s0, %s1316_s14  ;;  %p1320_p1 = scmp.lt.u32.totalorder %s1316_s14, %s1825_s0 }
   0x4   :  { %p1322_p2 = pnand %p1320_p1, %p1317_p0 }
   0x6   :  { %1325 = shalt.err (!%p1322_p2)  }
   0x7   :  { %s1400_s19 = smov [#allocation3]  }
   0x8   :  { %9 = dma.hbm_to_smem %s1825_s0, 16, %s1400_s19, [#allocation2] }
   0x9   :  { %1392 = dma.done.wait [#allocation2], 16 }
   0xa   :  { %1393 = vsyncadd [#allocation2], 4294967280 }
   0xb   :  { %11 = sfence }
   0xc   :  { %12 = vsyncpa [#allocation5], 0 }
   0xd   :  { %13 = vsyncpa [#allocation8], 0 }
   0xe   :  { %14 = vsyncpa [#allocation6], 0  ;;  %s1401_s22 = smov [#allocation4]   ;;  %s1326_s26 = scalar_lea.hbm %s1826_s1, 2048 }
   0xf   :  { %s20_s23 = sshll.u32 %s1401_s22, 4  ;;  %p1327_p3 = scmp.ne.s32.totalorder %s1826_s1, %s1326_s26  ;;  %s21_s23 = int_to_ptr.vmem [resolvable:$true] %s20_s23 }
  0x10   :  { %p1330_p4 = scmp.lt.u32.totalorder %s1326_s26, %s1826_s1 }
  0x12   :  { %p1332_p5 = pnand %p1330_p4, %p1327_p3 }
  0x14   :  { %1335 = shalt.err (!%p1332_p5)
}
  0x15   :  { %s1336_s0 = scalar_lea.vmem %s21_s23, 2048  ;;  %p1341_p7 = scmp.lt.s32.totalorder %s21_s23, %s21_s23 }
  0x16   :  { %p1337_p6 = scmp.ne.s32.totalorder %s21_s23, %s1336_s0  ;;  %p1342_p8 = scmp.lt.s32.totalorder %s1336_s0, %s1336_s0 }
  0x18   :  { %p1343_p9 = por %p1342_p8, %p1341_p7 }
  0x1a   :  { %p1344_p10 = pnand %p1343_p9, %p1337_p6 }
  0x1c   :  { %1347 = shalt.err (!%p1344_p10)
}
  0x1d   :  { %s1402_s4 = smov 128   ;;  %s1403_s5 = smov 8  }
  0x1e   :  { %26 = dma.hbm_to_vmem [thread:$0]  %s1826_s1, 2048, %s21_s23, [#allocation5], %s1402_s4, %s1402_s4, %s1403_s5  }
  0x1f   :  { %s1404_s8 = smov [#allocation7]   ;;  %s1348_s12 = scalar_lea.hbm %s1827_s2, 2048 }
  0x20   :  { %s32_s9 = sshll.u32 %s1404_s8, 4  ;;  %p1349_p11 = scmp.ne.s32.totalorder %s1827_s2, %s1348_s12  ;;  %s33_s9 = int_to_ptr.vmem [resolvable:$true] %s32_s9 }
  0x21   :  { %p1352_p12 = scmp.lt.u32.totalorder %s1348_s12, %s1827_s2 }
  0x23   :  { %p1354_p13 = pnand %p1352_p12, %p1349_p11 }
  0x25   :  { %1357 = shalt.err (!%p1354_p13)
}
  0x26   :  { %s1358_s17 = scalar_lea.vmem %s33_s9, 2048  ;;  %p1363_p1 = scmp.lt.s32.totalorder %s33_s9, %s33_s9 }
  0x27   :  { %p1359_p0 = scmp.ne.s32.totalorder %s33_s9, %s1358_s17  ;;  %p1364_p2 = scmp.lt.s32.totalorder %s1358_s17, %s1358_s17 }
  0x29   :  { %p1365_p3 = por %p1364_p2, %p1363_p1 }
  0x2b   :  { %p1366_p4 = pnand %p1365_p3, %p1359_p0 }
  0x2d   :  { %1369 = shalt.err (!%p1366_p4)
}
  0x2e   :  { %38 = dma.hbm_to_vmem [thread:$0]  %s1827_s2, 2048, %s33_s9, [#allocation8], %s1402_s4, %s1402_s4, %s1403_s5  }
  0x2f   :  { %1394 = dma.done.wait [#allocation5], 2048  }
  0x30   :  { %1395 = vsyncadd [#allocation5], 4294965248 }
  0x31   :  { %1396 = dma.done.wait [#allocation8], 2048  }
  0x32   :  { %1397 = vsyncadd [#allocation8], 4294965248  ;;  %v62_v0 = vld [vmem:[#allocation4] sm:$0xff]  ;;  %v63_v1 = vld [vmem:[#allocation4 + $0x8] sm:$0xff]  ;;  %s61_s2 = sld [smem:[#allocation3]]  ;;  %s827_s19 = sld [smem:[#allocation3 + $0x1]] }
  0x33   :  { %v64_v2 = vld [vmem:[#allocation4 + $0x10] sm:$0xff]  ;;  %v1182_v3 = vpack.c.bf16 %v63_v1, %v62_v0  ;;  %v65_v4 = vld [vmem:[#allocation4 + $0x18] sm:$0xff]  ;;  %v66_v6 = vld [vmem:[#allocation4 + $0x20] sm:$0xff]  ;;  %s828_s20 = sld [smem:[#allocation3 + $0x2]]  ;;  %s829_s21 = sld [smem:[#allocation3 + $0x3]] }
  0x34   :  { %v1186_v5 = vpack.c.bf16 %v65_v4, %v64_v2  ;;  %v67_v7 = vld [vmem:[#allocation4 + $0x28] sm:$0xff]  ;;  %v1468_v9 = vld [vmem:[#allocation7] sm:$0xff]  ;;  %v68_v10 = vld [vmem:[#allocation4 + $0x30] sm:$0xff]  ;;  %s1405_s22 = smov [#allocation9]  }
  0x35   :  { %1183 = vmatprep.subr.bf16.mxu0 %v1182_v3  ;;  %v1190_v8 = vpack.c.bf16 %v67_v7, %v66_v6  ;;  %v69_v11 = vld [vmem:[#allocation4 + $0x38] sm:$0xff]  ;;  %990 = vmatprep.mubr.f32.mxu0 %v1468_v9  ;;  %v70_v13 = vld [vmem:[#allocation4 + $0x40] sm:$0xff]  ;;  %v71_v14 = vld [vmem:[#allocation4 + $0x48] sm:$0xff]  ;;  %s814_s23 = sshll.u32 %s1405_s22, 4  ;;  %s815_s23 = int_to_ptr.vmem [resolvable:$true] %s814_s23 }
  0x36   :  { %1185 = vmatpush3.bf16.msra.mxu0 %v1182_v3  ;;  %1046 = vmatprep.mubr.f32.mxu1 %v1468_v9  ;;  %v1194_v12 = vpack.c.bf16 %v69_v11, %v68_v10  ;;  %v1198_v15 = vpack.c.bf16 %v71_v14, %v70_v13  ;;  %v72_v16 = vld [vmem:[#allocation4 + $0x50] sm:$0xff]  ;;  %v73_v17 = vld [vmem:[#allocation4 + $0x58] sm:$0xff]  ;;  %v74_v19 = vld [vmem:[#allocation4 + $0x60] sm:$0xff]  ;;  %s1370_s24 = scalar_lea.vmem %s815_s23, 2048  ;;  %p1375_p6 = scmp.lt.s32.totalorder %s815_s23, %s815_s23 }
  0x37   :  { %1187 = vmatprep.subr.bf16.mxu0 %v1186_v5  ;;  %v1202_v18 = vpack.c.bf16 %v73_v17, %v72_v16  ;;  %v75_v20 = vld [vmem:[#allocation4 + $0x68] sm:$0xff]  ;;  %v76_v22 = vld [vmem:[#allocation4 + $0x70] sm:$0xff]  ;;  %v77_v23 = vld [vmem:[#allocation4 + $0x78] sm:$0xff]  ;;  %p1371_p5 = scmp.ne.s32.totalorder %s815_s23, %s1370_s24  ;;  %p1376_p7 = scmp.lt.s32.totalorder %s1370_s24, %s1370_s24 }
  0x38   :  { %v1206_v21 = vpack.c.bf16 %v75_v20, %v74_v19  ;;  %v1210_v24 = vpack.c.bf16 %v77_v23, %v76_v22  ;;  %v1472_v25 = vld [vmem:[#allocation7 + $0x8] sm:$0xff]  ;;  %v1474_v26 = vld [vmem:[#allocation7 + $0x10] sm:$0xff]  ;;  %v1478_v27 = vld [vmem:[#allocation7 + $0x18] sm:$0xff]  ;;  %v223_v40 = vstv %s61_s2 }
  0x39   :  { %v1480_v28 = vld [vmem:[#allocation7 + $0x20] sm:$0xff]  ;;  %v1484_v29 = vld [vmem:[#allocation7 + $0x28] sm:$0xff]  ;;  %v1486_v30 = vld [vmem:[#allocation7 + $0x30] sm:$0xff]  ;;  %p1377_p8 = por %p1376_p7, %p1375_p6 }
  0x3a   :  { %1189 = vmatpush3.bf16.msra.mxu0 %v1186_v5  ;;  %v1490_v31 = vld [vmem:[#allocation7 + $0x38] sm:$0xff]  ;;  %v1492_v32 = vld [vmem:[#allocation7 + $0x40] sm:$0xff]  ;;  %v1496_v33 = vld [vmem:[#allocation7 + $0x48] sm:$0xff] }
  0x3b   :  { %1191 = vmatprep.subr.bf16.mxu0 %v1190_v8  ;;  %v1498_v34 = vld [vmem:[#allocation7 + $0x50] sm:$0xff]  ;;  %v1502_v35 = vld [vmem:[#allocation7 + $0x58] sm:$0xff]  ;;  %v1504_v36 = vld [vmem:[#allocation7 + $0x60] sm:$0xff]  ;;  %p1378_p9 = pnand %p1377_p8, %p1371_p5 }
  0x3c   :  { %v1508_v37 = vld [vmem:[#allocation7 + $0x68] sm:$0xff]  ;;  %v1510_v38 = vld [vmem:[#allocation7 + $0x70] sm:$0xff]  ;;  %v1514_v39 = vld [vmem:[#allocation7 + $0x78] sm:$0xff] }
  0x3e   :  { %1193 = vmatpush3.bf16.msra.mxu0 %v1190_v8 }
  0x3f   :  { %1195 = vmatprep.subr.bf16.mxu0 %v1194_v12 }
  0x42   :  { %1197 = vmatpush3.bf16.msra.mxu0 %v1194_v12 }
  0x43   :  { %1199 = vmatprep.subr.bf16.mxu0 %v1198_v15 }
  0x46   :  { %1201 = vmatpush3.bf16.msra.mxu0 %v1198_v15 }
  0x47   :  { %1203 = vmatprep.subr.bf16.mxu0 %v1202_v18 }
  0x4a   :  { %1205 = vmatpush3.bf16.msra.mxu0 %v1202_v18  ;;  %v1582_v18 = vstv %s827_s19 }
  0x4b   :  { %1207 = vmatprep.subr.bf16.mxu0 %v1206_v21 }
  0x4e   :  { %1209 = vmatpush3.bf16.msra.mxu0 %v1206_v21 }
  0x4f   :  { %1211 = vmatprep.subr.bf16.mxu0 %v1210_v24 }
  0x52   :  { %1213 = vmatpush3.bf16.msra.mxu0 %v1210_v24 }
  0x55   :  { %991 = vmatmul.mubr.f32.vlgmr.msra.gmra.mrb[0].mxu0 %v1472_v25 }
  0x56   :  { %993 = vmatprep.mubr.f32.mxu0 %v1474_v26 }
  0x59   :  { %994 = vmatmul.mubr.f32.gmra.mrb[2].mxu0 %v1478_v27 }
  0x5a   :  { %996 = vmatprep.mubr.f32.mxu0 %v1480_v28 }
  0x5d   :  { %997 = vmatmul.mubr.f32.gmra.mrb[4].mxu0 %v1484_v29 }
  0x5e   :  { %999 = vmatprep.mubr.f32.mxu0 %v1486_v30 }
  0x61   :  { %1000 = vmatmul.mubr.f32.gmra.mrb[6].mxu0 %v1490_v31 }
  0x62   :  { %1002 = vmatprep.mubr.f32.mxu0 %v1492_v32 }
  0x65   :  { %1003 = vmatmul.mubr.f32.gmra.mrb[8].mxu0 %v1496_v33 }
  0x66   :  { %1005 = vmatprep.mubr.f32.mxu0 %v1498_v34 }
  0x69   :  { %1006 = vmatmul.mubr.f32.gmra.mrb[10].mxu0 %v1502_v35 }
  0x6a   :  { %1008 = vmatprep.mubr.f32.mxu0 %v1504_v36 }
  0x6d   :  { %1009 = vmatmul.mubr.f32.gmra.mrb[12].mxu0 %v1508_v37 }
  0x6e   :  { %1011 = vmatprep.mubr.f32.mxu0 %v1510_v38 }
  0x71   :  { %1012 = vmatmul.mubr.f32.gmra.mrb[14].mxu0 %v1514_v39 }
  0x72   :  { %1102 = vmatprep.mubr.f32.mxu0 %v1468_v9 }
 0x128   :  { %v992_v41 = vpop.f32.mrb[0].mxu0 }
 0x129   :  { %v1518_v42 = vmul.f32 %v992_v41, %v223_v40  ;;  %v144_v43 = vpop.f32.mrb[1].mxu0 }
 0x12a   :  { %v1520_v44 = vmul.f32 %v223_v40, %v144_v43 }
 0x12c   :  { %v995_v45 = vpop.f32.mrb[2].mxu0  ;;  %v1214_v46 = vpack.c.bf16 %v1518_v42, %v1520_v44 }
 0x12d   :  { %v1524_v47 = vmul.f32 %v995_v45, %v223_v40  ;;  %v154_v48 = vpop.f32.mrb[3].mxu0 }
 0x12e   :  { %v1526_v49 = vmul.f32 %v223_v40, %v154_v48  ;;  %1215 = vmatprep.subr.bf16.mxu1 %v1214_v46 }
 0x12f   :  { %1217 = vmatpush3.bf16.msra.mxu1 %v1214_v46 }
 0x130   :  { %v1218_v50 = vpack.c.bf16 %v1524_v47, %v1526_v49  ;;  %v998_v51 = vpop.f32.mrb[4].mxu0 }
 0x131   :  { %v1530_v52 = vmul.f32 %v998_v51, %v223_v40  ;;  %v164_v53 = vpop.f32.mrb[5].mxu0 }
 0x132   :  { %v1532_v54 = vmul.f32 %v223_v40, %v164_v53  ;;  %1219 = vmatprep.subr.bf16.mxu1 %v1218_v50 }
 0x133   :  { %1221 = vmatpush3.bf16.msra.mxu1 %v1218_v50 }
 0x134   :  { %v1222_v55 = vpack.c.bf16 %v1530_v52, %v1532_v54  ;;  %v1001_v56 = vpop.f32.mrb[6].mxu0 }
 0x135   :  { %v1536_v57 = vmul.f32 %v1001_v56, %v223_v40  ;;  %v174_v58 = vpop.f32.mrb[7].mxu0 }
 0x136   :  { %v1538_v59 = vmul.f32 %v223_v40, %v174_v58  ;;  %1223 = vmatprep.subr.bf16.mxu1 %v1222_v55 }
 0x137   :  { %1225 = vmatpush3.bf16.msra.mxu1 %v1222_v55 }
 0x138   :  { %v1226_v60 = vpack.c.bf16 %v1536_v57, %v1538_v59  ;;  %v1004_v61 = vpop.f32.mrb[8].mxu0 }
 0x139   :  { %v1542_v62 = vmul.f32 %v1004_v61, %v223_v40  ;;  %v184_v63 = vpop.f32.mrb[9].mxu0 }
 0x13a   :  { %v1544_v0 = vmul.f32 %v223_v40, %v184_v63  ;;  %1227 = vmatprep.subr.bf16.mxu1 %v1226_v60 }
 0x13b   :  { %1229 = vmatpush3.bf16.msra.mxu1 %v1226_v60 }
 0x13c   :  { %v1230_v1 = vpack.c.bf16 %v1542_v62, %v1544_v0  ;;  %v1007_v2 = vpop.f32.mrb[10].mxu0 }
 0x13d   :  { %v1548_v3 = vmul.f32 %v1007_v2, %v223_v40  ;;  %v194_v4 = vpop.f32.mrb[11].mxu0 }
 0x13e   :  { %v1550_v5 = vmul.f32 %v223_v40, %v194_v4  ;;  %1231 = vmatprep.subr.bf16.mxu1 %v1230_v1 }
 0x13f   :  { %1233 = vmatpush3.bf16.msra.mxu1 %v1230_v1 }
 0x140   :  { %v1234_v6 = vpack.c.bf16 %v1548_v3, %v1550_v5  ;;  %v1010_v7 = vpop.f32.mrb[12].mxu0 }
 0x141   :  { %v1554_v8 = vmul.f32 %v1010_v7, %v223_v40  ;;  %v204_v10 = vpop.f32.mrb[13].mxu0 }
 0x142   :  { %v1556_v11 = vmul.f32 %v223_v40, %v204_v10  ;;  %1235 = vmatprep.subr.bf16.mxu1 %v1234_v6 }
 0x143   :  { %1237 = vmatpush3.bf16.msra.mxu1 %v1234_v6 }
 0x144   :  { %v1238_v12 = vpack.c.bf16 %v1554_v8, %v1556_v11  ;;  %v1013_v13 = vpop.f32.mrb[14].mxu0 }
 0x145   :  { %v1560_v14 = vmul.f32 %v1013_v13, %v223_v40  ;;  %v214_v15 = vpop.f32.mrb[15].mxu0 }
 0x146   :  { %v1562_v16 = vmul.f32 %v223_v40, %v214_v15  ;;  %1239 = vmatprep.subr.bf16.mxu1 %v1238_v12 }
 0x147   :  { %1241 = vmatpush3.bf16.msra.mxu1 %v1238_v12 }
 0x148   :  { %v1242_v17 = vpack.c.bf16 %v1560_v14, %v1562_v16 }
 0x14a   :  { %1243 = vmatprep.subr.bf16.mxu1 %v1242_v17 }
 0x14b   :  { %1245 = vmatpush3.bf16.msra.mxu1 %v1242_v17 }
 0x14e   :  { %1047 = vmatmul.mubr.f32.vlgmr.msra.gmra.mrb[0].mxu1 %v1472_v25 }
 0x14f   :  { %1049 = vmatprep.mubr.f32.mxu1 %v1474_v26 }
 0x152   :  { %1050 = vmatmul.mubr.f32.gmra.mrb[2].mxu1 %v1478_v27 }
 0x153   :  { %1052 = vmatprep.mubr.f32.mxu1 %v1480_v28 }
 0x156   :  { %1053 = vmatmul.mubr.f32.gmra.mrb[4].mxu1 %v1484_v29 }
 0x157   :  { %1055 = vmatprep.mubr.f32.mxu1 %v1486_v30 }
 0x15a   :  { %1056 = vmatmul.mubr.f32.gmra.mrb[6].mxu1 %v1490_v31 }
 0x15b   :  { %1058 = vmatprep.mubr.f32.mxu1 %v1492_v32 }
 0x15e   :  { %1059 = vmatmul.mubr.f32.gmra.mrb[8].mxu1 %v1496_v33 }
 0x15f   :  { %1061 = vmatprep.mubr.f32.mxu1 %v1498_v34 }
 0x162   :  { %1062 = vmatmul.mubr.f32.gmra.mrb[10].mxu1 %v1502_v35 }
 0x163   :  { %1064 = vmatprep.mubr.f32.mxu1 %v1504_v36 }
 0x166   :  { %1065 = vmatmul.mubr.f32.gmra.mrb[12].mxu1 %v1508_v37 }
 0x167   :  { %1067 = vmatprep.mubr.f32.mxu1 %v1510_v38 }
 0x16a   :  { %1068 = vmatmul.mubr.f32.gmra.mrb[14].mxu1 %v1514_v39 }
 0x16b   :  { %1158 = vmatprep.mubr.f32.mxu1 %v1468_v9 }
 0x221   :  { %v1048_v19 = vpop.f32.mrb[0].mxu1 }
 0x222   :  { %v388_v20 = vmul.f32 %v1048_v19, %v1582_v18  ;;  %v307_v21 = vpop.f32.mrb[1].mxu1 }
 0x223   :  { %v387_v22 = vmul.f32 %v1582_v18, %v307_v21 }
 0x224   :  { %v1587_v23 = vadd.f32 %v388_v20, %v1518_v42 }
 0x225   :  { %v1590_v24 = vadd.f32 %v387_v22, %v1520_v44  ;;  %v1051_v40 = vpop.f32.mrb[2].mxu1 }
 0x226   :  { %v390_v41 = vmul.f32 %v1051_v40, %v1582_v18  ;;  %v317_v43 = vpop.f32.mrb[3].mxu1 }
 0x227   :  { %v389_v9 = vmul.f32 %v1582_v18, %v317_v43  ;;  %v1246_v45 = vpack.c.bf16 %v1587_v23, %v1590_v24 }
 0x228   :  { %v1597_v46 = vadd.f32 %v390_v41, %v1524_v47 }
 0x229   :  { %v1600_v48 = vadd.f32 %v389_v9, %v1526_v49  ;;  %v1054_v42 = vpop.f32.mrb[4].mxu1  ;;  %1247 = vmatprep.subr.bf16.mxu0 %v1246_v45 }
 0x22a   :  { %v392_v44 = vmul.f32 %v1054_v42, %v1582_v18  ;;  %v327_v50 = vpop.f32.mrb[5].mxu1  ;;  %1249 = vmatpush3.bf16.msra.mxu0 %v1246_v45 }
 0x22b   :  { %v391_v51 = vmul.f32 %v1582_v18, %v327_v50  ;;  %v1250_v53 = vpack.c.bf16 %v1597_v46, %v1600_v48 }
 0x22c   :  { %v1607_v55 = vadd.f32 %v392_v44, %v1530_v52 }
 0x22d   :  { %v1610_v47 = vadd.f32 %v391_v51, %v1532_v54  ;;  %v1057_v56 = vpop.f32.mrb[6].mxu1  ;;  %1251 = vmatprep.subr.bf16.mxu0 %v1250_v53 }
 0x22e   :  { %v394_v49 = vmul.f32 %v1057_v56, %v1582_v18  ;;  %v337_v58 = vpop.f32.mrb[7].mxu1  ;;  %1253 = vmatpush3.bf16.msra.mxu0 %v1250_v53 }
 0x22f   :  { %v393_v60 = vmul.f32 %v1582_v18, %v337_v58  ;;  %v1254_v61 = vpack.c.bf16 %v1607_v55, %v1610_v47 }
 0x230   :  { %v1617_v63 = vadd.f32 %v394_v49, %v1536_v57 }
 0x231   :  { %v1620_v52 = vadd.f32 %v393_v60, %v1538_v59  ;;  %v1060_v1 = vpop.f32.mrb[8].mxu1  ;;  %1255 = vmatprep.subr.bf16.mxu0 %v1254_v61 }
 0x232   :  { %v396_v54 = vmul.f32 %v1060_v1, %v1582_v18  ;;  %v347_v2 = vpop.f32.mrb[9].mxu1  ;;  %1257 = vmatpush3.bf16.msra.mxu0 %v1254_v61 }
 0x233   :  { %v395_v4 = vmul.f32 %v1582_v18, %v347_v2  ;;  %v1258_v6 = vpack.c.bf16 %v1617_v63, %v1620_v52 }
 0x234   :  { %v1627_v7 = vadd.f32 %v396_v54, %v1542_v62 }
 0x235   :  { %v1630_v57 = vadd.f32 %v395_v4, %v1544_v0  ;;  %v1063_v10 = vpop.f32.mrb[10].mxu1  ;;  %1259 = vmatprep.subr.bf16.mxu0 %v1258_v6 }
 0x236   :  { %v398_v59 = vmul.f32 %v1063_v10, %v1582_v18  ;;  %v357_v12 = vpop.f32.mrb[11].mxu1  ;;  %1261 = vmatpush3.bf16.msra.mxu0 %v1258_v6 }
 0x237   :  { %v397_v13 = vmul.f32 %v1582_v18, %v357_v12  ;;  %v1262_v15 = vpack.c.bf16 %v1627_v7, %v1630_v57 }
 0x238   :  { %v1637_v17 = vadd.f32 %v398_v59, %v1548_v3 }
 0x239   :  { %v1640_v62 = vadd.f32 %v397_v13, %v1550_v5  ;;  %v1066_v19 = vpop.f32.mrb[12].mxu1  ;;  %1263 = vmatprep.subr.bf16.mxu0 %v1262_v15 }
 0x23a   :  { %v400_v0 = vmul.f32 %v1066_v19, %v1582_v18  ;;  %v367_v20 = vpop.f32.mrb[13].mxu1  ;;  %1265 = vmatpush3.bf16.msra.mxu0 %v1262_v15 }
 0x23b   :  { %v399_v21 = vmul.f32 %v1582_v18, %v367_v20  ;;  %v1266_v22 = vpack.c.bf16 %v1637_v17, %v1640_v62 }
 0x23c   :  { %v1647_v40 = vadd.f32 %v400_v0, %v1554_v8 }
 0x23d   :  { %v1650_v3 = vadd.f32 %v399_v21, %v1556_v11  ;;  %v1069_v41 = vpop.f32.mrb[14].mxu1  ;;  %1267 = vmatprep.subr.bf16.mxu0 %v1266_v22 }
 0x23e   :  { %v402_v5 = vmul.f32 %v1069_v41, %v1582_v18  ;;  %v377_v43 = vpop.f32.mrb[15].mxu1  ;;  %1269 = vmatpush3.bf16.msra.mxu0 %v1266_v22 }
 0x23f   :  { %v401_v9 = vmul.f32 %v1582_v18, %v377_v43  ;;  %v1270_v45 = vpack.c.bf16 %v1647_v40, %v1650_v3 }
 0x240   :  { %v1657_v42 = vadd.f32 %v402_v5, %v1560_v14  ;;  %v1679_v14 = vstv %s828_s20 }
 0x241   :  { %v1660_v8 = vadd.f32 %v401_v9, %v1562_v16  ;;  %1271 = vmatprep.subr.bf16.mxu0 %v1270_v45 }
 0x242   :  { %1273 = vmatpush3.bf16.msra.mxu0 %v1270_v45 }
 0x243   :  { %v1274_v11 = vpack.c.bf16 %v1657_v42, %v1660_v8 }
 0x245   :  { %1275 = vmatprep.subr.bf16.mxu0 %v1274_v11 }
 0x246   :  { %1277 = vmatpush3.bf16.msra.mxu0 %v1274_v11 }
 0x249   :  { %1103 = vmatmul.mubr.f32.vlgmr.msra.gmra.mrb[16].mxu0 %v1472_v25 }
 0x24a   :  { %1105 = vmatprep.mubr.f32.mxu0 %v1474_v26 }
 0x24d   :  { %1106 = vmatmul.mubr.f32.gmra.mrb[18].mxu0 %v1478_v27 }
 0x24e   :  { %1108 = vmatprep.mubr.f32.mxu0 %v1480_v28 }
 0x251   :  { %1109 = vmatmul.mubr.f32.gmra.mrb[20].mxu0 %v1484_v29 }
 0x252   :  { %1111 = vmatprep.mubr.f32.mxu0 %v1486_v30 }
 0x255   :  { %1112 = vmatmul.mubr.f32.gmra.mrb[22].mxu0 %v1490_v31 }
 0x256   :  { %1114 = vmatprep.mubr.f32.mxu0 %v1492_v32 }
 0x259   :  { %1115 = vmatmul.mubr.f32.gmra.mrb[24].mxu0 %v1496_v33 }
 0x25a   :  { %1117 = vmatprep.mubr.f32.mxu0 %v1498_v34 }
 0x25d   :  { %1118 = vmatmul.mubr.f32.gmra.mrb[26].mxu0 %v1502_v35 }
 0x25e   :  { %1120 = vmatprep.mubr.f32.mxu0 %v1504_v36 }
 0x261   :  { %1121 = vmatmul.mubr.f32.gmra.mrb[28].mxu0 %v1508_v37 }
 0x262   :  { %1123 = vmatprep.mubr.f32.mxu0 %v1510_v38 }
 0x265   :  { %1124 = vmatmul.mubr.f32.gmra.mrb[30].mxu0 %v1514_v39 }
 0x31c   :  { %v1104_v16 = vpop.f32.mrb[16].mxu0 }
 0x31d   :  { %v567_v18 = vmul.f32 %v1104_v16, %v1679_v14  ;;  %v486_v44 = vpop.f32.mrb[17].mxu0 }
 0x31e   :  { %v566_v50 = vmul.f32 %v1679_v14, %v486_v44 }
 0x31f   :  { %v1684_v51 = vadd.f32 %v567_v18, %v1587_v23 }
 0x320   :  { %v1687_v53 = vadd.f32 %v566_v50, %v1590_v24  ;;  %v1107_v56 = vpop.f32.mrb[18].mxu0 }
 0x321   :  { %v569_v49 = vmul.f32 %v1107_v56, %v1679_v14  ;;  %v496_v58 = vpop.f32.mrb[19].mxu0 }
 0x322   :  { %v568_v60 = vmul.f32 %v1679_v14, %v496_v58  ;;  %v1278_v61 = vpack.c.bf16 %v1684_v51, %v1687_v53 }
 0x323   :  { %v1694_v1 = vadd.f32 %v569_v49, %v1597_v46 }
 0x324   :  { %v1697_v54 = vadd.f32 %v568_v60, %v1600_v48  ;;  %v1110_v23 = vpop.f32.mrb[20].mxu0  ;;  %1279 = vmatprep.subr.bf16.mxu1 %v1278_v61 }
 0x325   :  { %v571_v24 = vmul.f32 %v1110_v23, %v1679_v14  ;;  %v506_v2 = vpop.f32.mrb[21].mxu0  ;;  %1281 = vmatpush3.bf16.msra.mxu1 %v1278_v61 }
 0x326   :  { %v570_v4 = vmul.f32 %v1679_v14, %v506_v2  ;;  %v1282_v6 = vpack.c.bf16 %v1694_v1, %v1697_v54 }
 0x327   :  { %v1704_v10 = vadd.f32 %v571_v24, %v1607_v55 }
 0x328   :  { %v1707_v46 = vadd.f32 %v570_v4, %v1610_v47  ;;  %v1113_v59 = vpop.f32.mrb[22].mxu0  ;;  %1283 = vmatprep.subr.bf16.mxu1 %v1282_v6 }
 0x329   :  { %v573_v48 = vmul.f32 %v1113_v59, %v1679_v14  ;;  %v516_v12 = vpop.f32.mrb[23].mxu0  ;;  %1285 = vmatpush3.bf16.msra.mxu1 %v1282_v6 }
 0x32a   :  { %v572_v13 = vmul.f32 %v1679_v14, %v516_v12  ;;  %v1286_v15 = vpack.c.bf16 %v1704_v10, %v1707_v46 }
 0x32b   :  { %v1714_v19 = vadd.f32 %v573_v48, %v1617_v63 }
 0x32c   :  { %v1717_v55 = vadd.f32 %v572_v13, %v1620_v52  ;;  %v1116_v0 = vpop.f32.mrb[24].mxu0  ;;  %1287 = vmatprep.subr.bf16.mxu1 %v1286_v15 }
 0x32d   :  { %v575_v47 = vmul.f32 %v1116_v0, %v1679_v14  ;;  %v526_v20 = vpop.f32.mrb[25].mxu0  ;;  %1289 = vmatpush3.bf16.msra.mxu1 %v1286_v15 }
 0x32e   :  { %v574_v21 = vmul.f32 %v1679_v14, %v526_v20  ;;  %v1290_v22 = vpack.c.bf16 %v1714_v19, %v1717_v55 }
 0x32f   :  { %v1724_v41 = vadd.f32 %v575_v47, %v1627_v7 }
 0x330   :  { %v1727_v63 = vadd.f32 %v574_v21, %v1630_v57  ;;  %v1119_v5 = vpop.f32.mrb[26].mxu0  ;;  %1291 = vmatprep.subr.bf16.mxu1 %v1290_v22 }
 0x331   :  { %v577_v52 = vmul.f32 %v1119_v5, %v1679_v14  ;;  %v536_v43 = vpop.f32.mrb[27].mxu0  ;;  %1293 = vmatpush3.bf16.msra.mxu1 %v1290_v22 }
 0x332   :  { %v576_v9 = vmul.f32 %v1679_v14, %v536_v43  ;;  %v1294_v45 = vpack.c.bf16 %v1724_v41, %v1727_v63 }
 0x333   :  { %v1734_v11 = vadd.f32 %v577_v52, %v1637_v17 }
 0x334   :  { %v1737_v7 = vadd.f32 %v576_v9, %v1640_v62  ;;  %v1122_v16 = vpop.f32.mrb[28].mxu0  ;;  %1295 = vmatprep.subr.bf16.mxu1 %v1294_v45 }
 0x335   :  { %v579_v57 = vmul.f32 %v1122_v16, %v1679_v14  ;;  %v546_v18 = vpop.f32.mrb[29].mxu0  ;;  %1297 = vmatpush3.bf16.msra.mxu1 %v1294_v45 }
 0x336   :  { %v578_v44 = vmul.f32 %v1679_v14, %v546_v18  ;;  %v1298_v50 = vpack.c.bf16 %v1734_v11, %v1737_v7 }
 0x337   :  { %v1744_v56 = vadd.f32 %v579_v57, %v1647_v40 }
 0x338   :  { %v1747_v17 = vadd.f32 %v578_v44, %v1650_v3  ;;  %v1125_v49 = vpop.f32.mrb[30].mxu0  ;;  %1299 = vmatprep.subr.bf16.mxu1 %v1298_v50 }
 0x339   :  { %v581_v62 = vmul.f32 %v1125_v49, %v1679_v14  ;;  %v556_v58 = vpop.f32.mrb[31].mxu0  ;;  %1301 = vmatpush3.bf16.msra.mxu1 %v1298_v50 }
 0x33a   :  { %v580_v60 = vmul.f32 %v1679_v14, %v556_v58  ;;  %v1302_v61 = vpack.c.bf16 %v1744_v56, %v1747_v17 }
 0x33b   :  { %v1754_v23 = vadd.f32 %v581_v62, %v1657_v42 }
 0x33c   :  { %v1757_v40 = vadd.f32 %v580_v60, %v1660_v8  ;;  %1303 = vmatprep.subr.bf16.mxu1 %v1302_v61 }
 0x33d   :  { %1305 = vmatpush3.bf16.msra.mxu1 %v1302_v61 }
 0x33e   :  { %v1306_v3 = vpack.c.bf16 %v1754_v23, %v1757_v40 }
 0x340   :  { %1307 = vmatprep.subr.bf16.mxu1 %v1306_v3 }
 0x341   :  { %1309 = vmatpush3.bf16.msra.mxu1 %v1306_v3 }
 0x344   :  { %1159 = vmatmul.mubr.f32.vlgmr.msra.gmra.mrb[16].mxu1 %v1472_v25  ;;  %v1776_v25 = vstv %s829_s21 }
 0x345   :  { %1161 = vmatprep.mubr.f32.mxu1 %v1474_v26 }
 0x348   :  { %1162 = vmatmul.mubr.f32.gmra.mrb[18].mxu1 %v1478_v27 }
 0x349   :  { %1164 = vmatprep.mubr.f32.mxu1 %v1480_v28 }
 0x34c   :  { %1165 = vmatmul.mubr.f32.gmra.mrb[20].mxu1 %v1484_v29 }
 0x34d   :  { %1167 = vmatprep.mubr.f32.mxu1 %v1486_v30 }
 0x350   :  { %1168 = vmatmul.mubr.f32.gmra.mrb[22].mxu1 %v1490_v31 }
 0x351   :  { %1170 = vmatprep.mubr.f32.mxu1 %v1492_v32 }
 0x354   :  { %1171 = vmatmul.mubr.f32.gmra.mrb[24].mxu1 %v1496_v33 }
 0x355   :  { %1173 = vmatprep.mubr.f32.mxu1 %v1498_v34 }
 0x358   :  { %1174 = vmatmul.mubr.f32.gmra.mrb[26].mxu1 %v1502_v35 }
 0x359   :  { %1176 = vmatprep.mubr.f32.mxu1 %v1504_v36 }
 0x35c   :  { %1177 = vmatmul.mubr.f32.gmra.mrb[28].mxu1 %v1508_v37 }
 0x35d   :  { %1179 = vmatprep.mubr.f32.mxu1 %v1510_v38 }
 0x360   :  { %1180 = vmatmul.mubr.f32.gmra.mrb[30].mxu1 %v1514_v39 }
 0x417   :  { %v1160_v26 = vpop.f32.mrb[16].mxu1 }
 0x418   :  { %v746_v27 = vmul.f32 %v1160_v26, %v1776_v25  ;;  %v665_v28 = vpop.f32.mrb[17].mxu1 }
 0x419   :  { %v745_v29 = vmul.f32 %v1776_v25, %v665_v28 }
 0x41a   :  { %v762_v30 = vadd.f32 %v746_v27, %v1684_v51 }
 0x41b   :  { %v761_v31 = vadd.f32 %v745_v29, %v1687_v53  ;;  %v1163_v32 = vpop.f32.mrb[18].mxu1 }
 0x41c   :  { %v778_v33 = vmul.f32 0.25, %v762_v30  ;;  %v748_v34 = vmul.f32 %v1163_v32, %v1776_v25  ;;  %v675_v35 = vpop.f32.mrb[19].mxu1 }
 0x41d   :  { %v777_v36 = vmul.f32 0.25, %v761_v31  ;;  %v747_v37 = vmul.f32 %v1776_v25, %v675_v35 }
 0x41e   :  { %794 = vst [vmem:[#allocation9 + $0x8] sm:$0xff] %v778_v33  ;;  %v764_v38 = vadd.f32 %v748_v34, %v1694_v1 }
 0x41f   :  { %793 = vst [vmem:[#allocation9] sm:$0xff] %v777_v36  ;;  %v763_v39 = vadd.f32 %v747_v37, %v1697_v54  ;;  %v1166_v42 = vpop.f32.mrb[20].mxu1 }
 0x420   :  { %v780_v8 = vmul.f32 0.25, %v764_v38  ;;  %v750_v14 = vmul.f32 %v1166_v42, %v1776_v25  ;;  %v685_v51 = vpop.f32.mrb[21].mxu1 }
 0x421   :  { %v779_v53 = vmul.f32 0.25, %v763_v39  ;;  %v749_v24 = vmul.f32 %v1776_v25, %v685_v51 }
 0x422   :  { %796 = vst [vmem:[#allocation9 + $0x18] sm:$0xff] %v780_v8  ;;  %v766_v2 = vadd.f32 %v750_v14, %v1704_v10 }
 0x423   :  { %795 = vst [vmem:[#allocation9 + $0x10] sm:$0xff] %v779_v53  ;;  %v765_v4 = vadd.f32 %v749_v24, %v1707_v46  ;;  %v1169_v6 = vpop.f32.mrb[22].mxu1 }
 0x424   :  { %v782_v59 = vmul.f32 0.25, %v766_v2  ;;  %v752_v1 = vmul.f32 %v1169_v6, %v1776_v25  ;;  %v695_v48 = vpop.f32.mrb[23].mxu1 }
 0x425   :  { %v781_v54 = vmul.f32 0.25, %v765_v4  ;;  %v751_v12 = vmul.f32 %v1776_v25, %v695_v48 }
 0x426   :  { %798 = vst [vmem:[#allocation9 + $0x28] sm:$0xff] %v782_v59  ;;  %v768_v13 = vadd.f32 %v752_v1, %v1714_v19 }
 0x427   :  { %797 = vst [vmem:[#allocation9 + $0x20] sm:$0xff] %v781_v54  ;;  %v767_v15 = vadd.f32 %v751_v12, %v1717_v55  ;;  %v1172_v0 = vpop.f32.mrb[24].mxu1 }
 0x428   :  { %v784_v47 = vmul.f32 0.25, %v768_v13  ;;  %v754_v10 = vmul.f32 %v1172_v0, %v1776_v25  ;;  %v705_v20 = vpop.f32.mrb[25].mxu1 }
 0x429   :  { %v783_v46 = vmul.f32 0.25, %v767_v15  ;;  %v753_v21 = vmul.f32 %v1776_v25, %v705_v20 }
 0x42a   :  { %800 = vst [vmem:[#allocation9 + $0x38] sm:$0xff] %v784_v47  ;;  %v770_v22 = vadd.f32 %v754_v10, %v1724_v41 }
 0x42b   :  { %799 = vst [vmem:[#allocation9 + $0x30] sm:$0xff] %v783_v46  ;;  %v769_v5 = vadd.f32 %v753_v21, %v1727_v63  ;;  %v1175_v52 = vpop.f32.mrb[26].mxu1 }
 0x42c   :  { %v786_v43 = vmul.f32 0.25, %v770_v22  ;;  %v756_v19 = vmul.f32 %v1175_v52, %v1776_v25  ;;  %v715_v9 = vpop.f32.mrb[27].mxu1 }
 0x42d   :  { %v785_v55 = vmul.f32 0.25, %v769_v5  ;;  %v755_v45 = vmul.f32 %v1776_v25, %v715_v9 }
 0x42e   :  { %802 = vst [vmem:[#allocation9 + $0x48] sm:$0xff] %v786_v43  ;;  %v772_v16 = vadd.f32 %v756_v19, %v1734_v11 }
 0x42f   :  { %801 = vst [vmem:[#allocation9 + $0x40] sm:$0xff] %v785_v55  ;;  %v771_v57 = vadd.f32 %v755_v45, %v1737_v7  ;;  %v1178_v18 = vpop.f32.mrb[28].mxu1 }
 0x430   :  { %v788_v44 = vmul.f32 0.25, %v772_v16  ;;  %v758_v41 = vmul.f32 %v1178_v18, %v1776_v25  ;;  %v725_v50 = vpop.f32.mrb[29].mxu1 }
 0x431   :  { %v787_v63 = vmul.f32 0.25, %v771_v57  ;;  %v757_v49 = vmul.f32 %v1776_v25, %v725_v50 }
 0x432   :  { %804 = vst [vmem:[#allocation9 + $0x58] sm:$0xff] %v788_v44  ;;  %v774_v62 = vadd.f32 %v758_v41, %v1744_v56 }
 0x433   :  { %803 = vst [vmem:[#allocation9 + $0x50] sm:$0xff] %v787_v63  ;;  %v773_v58 = vadd.f32 %v757_v49, %v1747_v17  ;;  %v1181_v60 = vpop.f32.mrb[30].mxu1 }
 0x434   :  { %v790_v61 = vmul.f32 0.25, %v774_v62  ;;  %v760_v11 = vmul.f32 %v1181_v60, %v1776_v25  ;;  %v735_v3 = vpop.f32.mrb[31].mxu1 }
 0x435   :  { %v789_v7 = vmul.f32 0.25, %v773_v58  ;;  %v759_v26 = vmul.f32 %v1776_v25, %v735_v3 }
 0x436   :  { %806 = vst [vmem:[#allocation9 + $0x68] sm:$0xff] %v790_v61  ;;  %v776_v27 = vadd.f32 %v760_v11, %v1754_v23 }
 0x437   :  { %805 = vst [vmem:[#allocation9 + $0x60] sm:$0xff] %v789_v7  ;;  %v775_v28 = vadd.f32 %v759_v26, %v1757_v40 }
 0x438   :  { %v792_v56 = vmul.f32 0.25, %v776_v27 }
 0x439   :  { %v791_v29 = vmul.f32 0.25, %v775_v28 }
 0x43a   :  { %808 = vst [vmem:[#allocation9 + $0x78] sm:$0xff] %v792_v56 }
 0x43b   :  { %807 = vst [vmem:[#allocation9 + $0x70] sm:$0xff] %v791_v29 }
 0x43c   :  { %1381 = shalt.err (!%p1378_p9)
}
 0x43d   :  { %s1382_s27 = scalar_lea.hbm %s1828_s3, 2048 }
 0x43e   :  { %p1383_p10 = scmp.ne.s32.totalorder %s1828_s3, %s1382_s27  ;;  %p1386_p11 = scmp.lt.u32.totalorder %s1382_s27, %s1828_s3 }
 0x440   :  { %p1388_p12 = pnand %p1386_p11, %p1383_p10 }
 0x442   :  { %1391 = shalt.err (!%p1388_p12)
}
 0x443   :  { %820 = dma.vmem_to_hbm [thread:$0]  %s815_s23, 2048, %s1828_s3, [#allocation6], %s1402_s4, %s1402_s4, %s1403_s5  }
 0x444   :  { %1398 = dma.done.wait [#allocation6], 2048  }
 0x445   :  { %1399 = vsyncadd [#allocation6], 4294965248 }
 0x446   :  { %824 = vsyncpa [#allocation5], 1 }
 0x447   :  { %825 = vsyncpa [#allocation8], 1 }
 0x448   :  { %826 = vsyncpa [#allocation6], 1 }

</bundles_post_ra>
